<compile_context>
chip_gen: v7x
topology: tpu7x:2x2x1
jax: 0.10.0
libtpu: 0.0.40
codegen_flags: <defaults>
</compile_context>

<pallas_src>
import functools
import math

import jax
import jax.numpy as jnp
from jax import lax
from jax.experimental import pallas as pl
from jax.experimental.pallas import tpu as pltpu

EPS = 1e-5

LANE = 128      # lane (last-dim) granularity
SUBLANE = 8     # sublane (second-to-last-dim) granularity
TM_MAX = 256    # node-row tile (MXU friendly on v6e/v7x, fine on v5e)
TK_MAX = 512    # adj reduction tile: 256x512 bf16 = 256 KiB per buffer


def _round_up(x, m):
    return (x + m - 1) // m * m


def _node_tiling(n):
    """Choose (n_pad, tm, tk) for the node axis."""
    if n <= TM_MAX:
        n_pad = _round_up(n, SUBLANE)
        return n_pad, n_pad, n_pad
    n_pad = _round_up(n, TM_MAX)
    tk = TK_MAX if n_pad % TK_MAX == 0 else TM_MAX
    return n_pad, TM_MAX, tk


def _pad2d(a, shape, dtype):
    out = jnp.zeros(shape, dtype)
    return out.at[: a.shape[0], : a.shape[1]].set(a.astype(dtype))


# ---------------- K1: support = x @ W  (per node-row tile) ------------------
def _support_kernel(x_ref, w_ref, o_ref):
    o_ref[...] = jnp.dot(x_ref[...], w_ref[...],
                         preferred_element_type=jnp.float32).astype(o_ref.dtype)


def _support(x_pad, w_pad, *, tm):
    n_pad, f_in_pad = x_pad.shape
    f_out_pad = w_pad.shape[1]
    return pl.pallas_call(
        _support_kernel,
        out_shape=jax.ShapeDtypeStruct((n_pad, f_out_pad), jnp.bfloat16),
        grid=(n_pad // tm,),
        in_specs=[
            pl.BlockSpec((tm, f_in_pad), lambda i: (i, 0)),
            pl.BlockSpec((f_in_pad, f_out_pad), lambda i: (0, 0)),
        ],
        out_specs=pl.BlockSpec((tm, f_out_pad), lambda i: (i, 0)),
        compiler_params=pltpu.CompilerParams(
            dimension_semantics=("parallel",)),
    )(x_pad, w_pad)


# ------------- K2: agg = adj @ support + bias  (tiled over (m, k)) ----------
def _aggregate_kernel(adj_ref, s_ref, p_ref, o_ref, acc_ref):
    k = pl.program_id(1)

    @pl.when(k == 0)
    def _():
        acc_ref[...] = jnp.zeros_like(acc_ref)

    acc_ref[...] += jnp.dot(adj_ref[...], s_ref[...],
                            preferred_element_type=jnp.float32)

    @pl.when(k == pl.num_programs(1) - 1)
    def _():
        bias = p_ref[...][0:1, :]
        o_ref[...] = (acc_ref[...] + bias).astype(o_ref.dtype)


def _aggregate(adj_pad, support, pack, *, tm, tk):
    n_pad = adj_pad.shape[0]
    f_out_pad = support.shape[1]
    return pl.pallas_call(
        _aggregate_kernel,
        out_shape=jax.ShapeDtypeStruct((n_pad, f_out_pad), jnp.float32),
        grid=(n_pad // tm, n_pad // tk),
        in_specs=[
            pl.BlockSpec((tm, tk), lambda i, k: (i, k)),
            pl.BlockSpec((tk, f_out_pad), lambda i, k: (k, 0)),
            pl.BlockSpec((SUBLANE, f_out_pad), lambda i, k: (0, 0)),
        ],
        out_specs=pl.BlockSpec((tm, f_out_pad), lambda i, k: (i, 0)),
        scratch_shapes=[pltpu.VMEM((tm, f_out_pad), jnp.float32)],
        compiler_params=pltpu.CompilerParams(
            dimension_semantics=("parallel", "arbitrary")),
    )(adj_pad, support, pack)


# -------- K3: per-feature sum / sum-of-squares over valid node rows ---------
def _stats_kernel(agg_ref, o_ref, *, tm, n_valid):
    i = pl.program_id(0)

    @pl.when(i == 0)
    def _():
        o_ref[...] = jnp.zeros_like(o_ref)

    x = agg_ref[...]
    row = i * tm + lax.broadcasted_iota(jnp.int32, x.shape, 0)
    x = jnp.where(row < n_valid, x, 0.0)          # mask padded node rows
    s = jnp.sum(x, axis=0, keepdims=True)
    sq = jnp.sum(x * x, axis=0, keepdims=True)

    rid = lax.broadcasted_iota(jnp.int32, o_ref.shape, 0)
    upd = jnp.where(rid == 0, jnp.broadcast_to(s, o_ref.shape),
                    jnp.where(rid == 1, jnp.broadcast_to(sq, o_ref.shape), 0.0))
    o_ref[...] += upd


def _graph_stats(agg, *, tm, n_valid):
    n_pad, f_out_pad = agg.shape
    kernel = functools.partial(_stats_kernel, tm=tm, n_valid=n_valid)
    return pl.pallas_call(
        kernel,
        out_shape=jax.ShapeDtypeStruct((SUBLANE, f_out_pad), jnp.float32),
        grid=(n_pad // tm,),
        in_specs=[pl.BlockSpec((tm, f_out_pad), lambda i: (i, 0))],
        out_specs=pl.BlockSpec((SUBLANE, f_out_pad), lambda i: (0, 0)),
        compiler_params=pltpu.CompilerParams(
            dimension_semantics=("arbitrary",)),   # output accumulates over i
    )(agg)


# -------- K4: graph-norm + node-norm + relu / log_softmax -------------------
def _apply_kernel(agg_ref, stats_ref, p_ref, o_ref, *,
                  n_valid, f_valid, apply_relu, apply_log_softmax):
    x = agg_ref[...]                               # (tm, f_pad) f32
    st = stats_ref[...]
    pk = p_ref[...]                                # rows: b, gg, gb, ng, nb

    # GraphNormalization: stats over all valid nodes (from K3), per feature.
    inv_n = 1.0 / n_valid
    mean_g = st[0:1, :] * inv_n
    var_g = jnp.maximum(st[1:2, :] * inv_n - mean_g * mean_g, 0.0)
    x = (x - mean_g) * lax.rsqrt(var_g + EPS) * pk[1:2, :] + pk[2:3, :]

    # NodeNormalization: stats over valid feature columns, per node.
    col = lax.broadcasted_iota(jnp.int32, x.shape, 1)
    valid = col < f_valid
    xm = jnp.where(valid, x, 0.0)
    inv_f = 1.0 / f_valid
    mean_n = jnp.sum(xm, axis=1, keepdims=True) * inv_f
    var_n = jnp.maximum(jnp.sum(xm * xm, axis=1, keepdims=True) * inv_f
                        - mean_n * mean_n, 0.0)
    x = (x - mean_n) * lax.rsqrt(var_n + EPS) * pk[3:4, :] + pk[4:5, :]

    if apply_relu:
        x = jnp.maximum(x, 0.0)

    if apply_log_softmax:
        xl = jnp.where(valid, x, -1e30)            # exclude padded columns
        m = jnp.max(xl, axis=1, keepdims=True)
        lse = m + jnp.log(jnp.sum(jnp.exp(xl - m), axis=1, keepdims=True))
        x = x - lse

    o_ref[...] = x.astype(o_ref.dtype)


def _apply_norms(agg, stats, pack, *, tm, n_valid, f_valid,
                 apply_relu, apply_log_softmax, out_dtype):
    n_pad, f_out_pad = agg.shape
    kernel = functools.partial(_apply_kernel, n_valid=n_valid, f_valid=f_valid,
                               apply_relu=apply_relu,
                               apply_log_softmax=apply_log_softmax)
    return pl.pallas_call(
        kernel,
        out_shape=jax.ShapeDtypeStruct((n_pad, f_out_pad), out_dtype),
        grid=(n_pad // tm,),
        in_specs=[
            pl.BlockSpec((tm, f_out_pad), lambda i: (i, 0)),
            pl.BlockSpec((SUBLANE, f_out_pad), lambda i: (0, 0)),
            pl.BlockSpec((SUBLANE, f_out_pad), lambda i: (0, 0)),
        ],
        out_specs=pl.BlockSpec((tm, f_out_pad), lambda i: (i, 0)),
        compiler_params=pltpu.CompilerParams(
            dimension_semantics=("parallel",)),
    )(agg, stats, pack)


# ---------------------------- layer / model ---------------------------------
def gcn_layer(h, adj_pad, layer, *, tm, tk, n_valid,
              apply_relu, apply_log_softmax):
    w_pad, pack, f_valid = layer
    support = _support(h, w_pad, tm=tm)
    agg = _aggregate(adj_pad, support, pack, tm=tm, tk=tk)
    stats = _graph_stats(agg, tm=tm, n_valid=n_valid)
    out_dtype = jnp.float32 if apply_log_softmax else jnp.bfloat16
    return _apply_norms(agg, stats, pack, tm=tm, n_valid=n_valid,
                        f_valid=f_valid, apply_relu=apply_relu,
                        apply_log_softmax=apply_log_softmax,
                        out_dtype=out_dtype)


def init_gcn_params(key, nfeat, nhid, nclass, nlayer):
    """Deterministic parameter init mirroring pygcn's uniform(-stdv, stdv)."""
    gap = (nfeat - nhid) // nlayer
    dims = [nfeat]
    for i in range(nlayer):
        dims.append(nhid + gap * (nlayer - 1 - i))
    dims.append(nclass)

    params = []
    for li in range(nlayer + 1):
        f_in, f_out = dims[li], dims[li + 1]
        key, kw, kb = jax.random.split(key, 3)
        stdv = 1.0 / math.sqrt(f_out)
        params.append(dict(
            w=jax.random.uniform(kw, (f_in, f_out), jnp.float32, -stdv, stdv),
            b=jax.random.uniform(kb, (f_out,), jnp.float32, -stdv, stdv),
            gg=jnp.ones((f_out,), jnp.float32),   # GraphNormalization gamma
            gb=jnp.zeros((f_out,), jnp.float32),  # GraphNormalization beta
            ng=jnp.ones((f_out,), jnp.float32),   # NodeNormalization gamma
            nb=jnp.zeros((f_out,), jnp.float32),  # NodeNormalization beta
        ))
    return params


def prepare_params(params):
    """Pad to (8,128) granularity, cast weights to bf16, and pack the five tiny
    per-feature vectors into one (8, F_out_pad) f32 slab (single DMA)."""
    prepped = []
    for p in params:
        f_in, f_out = p["w"].shape
        f_in_pad = _round_up(f_in, LANE)
        f_out_pad = _round_up(f_out, LANE)
        w_pad = _pad2d(p["w"], (f_in_pad, f_out_pad), jnp.bfloat16)
        pack = jnp.zeros((SUBLANE, f_out_pad), jnp.float32)
        for r, name in enumerate(("b", "gg", "gb", "ng", "nb")):
            pack = pack.at[r, :f_out].set(p[name])
        prepped.append((w_pad, pack, f_out))
    return prepped


def gcn_forward(x, adj, params_prepped, nlayer, dropout=0.5):
    # F.dropout with training=False -> identity (inference mode).
    del dropout
    n, nfeat = x.shape
    n_pad, tm, tk = _node_tiling(n)
    f_in_pad = _round_up(nfeat, LANE)

    h = _pad2d(x, (n_pad, f_in_pad), jnp.bfloat16)
    adj_pad = _pad2d(adj, (n_pad, n_pad), jnp.bfloat16)

    for i in range(nlayer):
        h = gcn_layer(h, adj_pad, params_prepped[i], tm=tm, tk=tk, n_valid=n,
                      apply_relu=True, apply_log_softmax=False)
    out = gcn_layer(h, adj_pad, params_prepped[nlayer], tm=tm, tk=tk,
                    n_valid=n, apply_relu=False, apply_log_softmax=True)
    nclass = params_prepped[nlayer][2]
    return out[:n, :nclass]


if __name__ == "__main__":
    nfeat, nhid, nclass, nlayer = 32, 16, 8, 2
    n_nodes = 16

    key = jax.random.PRNGKey(0)
    kx, kadj, kparam = jax.random.split(key, 3)

    x = jax.random.normal(kx, (n_nodes, nfeat), jnp.float32)

    # symmetric, row-normalized dense adjacency with self loops
    a = (jax.random.uniform(kadj, (n_nodes, n_nodes)) > 0.7).astype(jnp.float32)
    a = jnp.maximum(a, a.T) + jnp.eye(n_nodes, dtype=jnp.float32)
    deg = jnp.sum(a, axis=1, keepdims=True)
    adj = a / deg

    params = prepare_params(init_gcn_params(kparam, nfeat, nhid, nclass, nlayer))

    out = gcn_forward(x, adj, params, nlayer)
    out = jax.block_until_ready(out)

    assert out.shape == (n_nodes, nclass), out.shape
    # rows of log_softmax must exp-sum to 1
    assert jnp.allclose(jnp.sum(jnp.exp(out), axis=1), 1.0, atol=1e-3)
    print("KERNEL_OK")
</pallas_src>

<mosaic_0001>
module attributes {stable_mosaic.version = 11 : i64} {
  func.func @_support_kernel(%arg0: i32, %arg1: memref<16x128xbf16, #tpu.memory_space<vmem>>, %arg2: memref<128x128xbf16, #tpu.memory_space<vmem>>, %arg3: memref<16x128xbf16, #tpu.memory_space<vmem>>) attributes {dimension_semantics = [#tpu.dimension_semantics<parallel>], iteration_bounds = array<i64: 1>, scalar_prefetch = 0 : i64, scratch_operands = 0 : i64, tpu.core_type = #tpu.core_type<tc>, window_params = [{transform_indices = @transform_0, window_bounds = array<i64: 16, 128>}, {pipeline_mode = #tpu.pipeline_mode<synchronous>, transform_indices = @transform_1, window_bounds = array<i64: 128, 128>}, {transform_indices = @transform_2, window_bounds = array<i64: 16, 128>}]} {
    %c0 = arith.constant 0 : index
    %c0_0 = arith.constant 0 : index
    %0 = vector.load %arg1[%c0, %c0_0] : memref<16x128xbf16, #tpu.memory_space<vmem>>, vector<16x128xbf16>
    %c0_1 = arith.constant 0 : index
    %c0_2 = arith.constant 0 : index
    %1 = vector.load %arg2[%c0_1, %c0_2] : memref<128x128xbf16, #tpu.memory_space<vmem>>, vector<128x128xbf16>
    %cst = arith.constant dense<0.000000e+00> : vector<16x128xf32>
    %2 = tpu.matmul %0, %1, %cst {dimension_numbers = #tpu.dot_dimension_numbers<[1], [0], [0], [1], [0, 0, 1, 1], [], []>} : vector<16x128xbf16>, vector<128x128xbf16>, vector<16x128xf32> -> vector<16x128xf32>
    %3 = arith.truncf %2 : vector<16x128xf32> to vector<16x128xbf16>
    %c0_3 = arith.constant 0 : index
    %c0_4 = arith.constant 0 : index
    %4 = vector.load %arg3[%c0_3, %c0_4] : memref<16x128xbf16, #tpu.memory_space<vmem>>, vector<16x128xbf16>
    tpu.vector_store %arg3[%c0_3, %c0_4], %3 {strides = array<i32>} : memref<16x128xbf16, #tpu.memory_space<vmem>>, vector<16x128xbf16>,
    return
  }
  func.func @transform_0(%arg0: i32) -> (i32, i32) {
    %c0_i32 = arith.constant 0 : i32
    %c0_i32_0 = arith.constant 0 : i32
    return %arg0, %c0_i32 : i32, i32
  }
  func.func @transform_1(%arg0: i32) -> (i32, i32) {
    %c0_i32 = arith.constant 0 : i32
    %c0_i32_0 = arith.constant 0 : i32
    %c0_i32_1 = arith.constant 0 : i32
    return %c0_i32, %c0_i32_0 : i32, i32
  }
  func.func @transform_2(%arg0: i32) -> (i32, i32) {
    %c0_i32 = arith.constant 0 : i32
    %c0_i32_0 = arith.constant 0 : i32
    return %arg0, %c0_i32 : i32, i32
  }
}

</mosaic_0001>

<bundles_post_ra>
// kernel: tpu_custom_call.1
= control target key start
LH: loop header
LB: loop body
LE: loop exit
PB: predicated region body
PF: predicated region fallthrough
CT: control target
= control target key end

     0   :  { %7 = vsyncpa [#allocation3], 0  ;;  %s384_s0 = inlined_call_operand.hbm [shape: bf16[16,128], index: 0, kind: input, shape index: {}]   ;;  %s385_s1 = inlined_call_operand.hbm [shape: bf16[128,128], index: 1, kind: input, shape index: {}]   ;;  %s386_s2 = inlined_call_operand.hbm [shape: bf16[16,128], index: 2, kind: output, shape index: {}]  }
   0x1   :  { %8 = vsyncpa [#allocation6], 0 }
   0x2   :  { %9 = vsyncpa [#allocation4], 0  ;;  %s317_s9 = smov [#allocation2]   ;;  %s245_s13 = scalar_lea.hbm %s384_s0, 128 }
   0x3   :  { %s15_s10 = sshll.u32 %s317_s9, 4  ;;  %p246_p0 = scmp.ne.s32.totalorder %s384_s0, %s245_s13  ;;  %s16_s10 = int_to_ptr.vmem [resolvable:$true] %s15_s10 }
   0x4   :  { %p249_p1 = scmp.lt.u32.totalorder %s245_s13, %s384_s0 }
   0x6   :  { %p251_p2 = pnand %p249_p1, %p246_p0 }
   0x8   :  { %254 = shalt.err (!%p251_p2)
}
   0x9   :  { %s255_s18 = scalar_lea.vmem %s16_s10, 128  ;;  %p260_p4 = scmp.lt.s32.totalorder %s16_s10, %s16_s10 }
   0xa   :  { %p256_p3 = scmp.ne.s32.totalorder %s16_s10, %s255_s18  ;;  %p261_p5 = scmp.lt.s32.totalorder %s255_s18, %s255_s18 }
   0xc   :  { %p262_p6 = por %p261_p5, %p260_p4 }
   0xe   :  { %p263_p7 = pnand %p262_p6, %p256_p3 }
  0x10   :  { %266 = shalt.err (!%p263_p7)
}
  0x11   :  { %s318_s19 = smov 64   ;;  %s319_s20 = smov 4  }
  0x12   :  { %21 = dma.hbm_to_vmem [thread:$0]  %s384_s0, 128, %s16_s10, [#allocation3], %s318_s19, %s318_s19, %s319_s20  }
  0x13   :  { %s320_s23 = smov [#allocation5]   ;;  %s267_s27 = scalar_lea.hbm %s385_s1, 1024 }
  0x14   :  { %s27_s24 = sshll.u32 %s320_s23, 4  ;;  %p268_p8 = scmp.ne.s32.totalorder %s385_s1, %s267_s27  ;;  %s28_s24 = int_to_ptr.vmem [resolvable:$true] %s27_s24 }
  0x15   :  { %p271_p9 = scmp.lt.u32.totalorder %s267_s27, %s385_s1 }
  0x17   :  { %p273_p10 = pnand %p271_p9, %p268_p8 }
  0x19   :  { %276 = shalt.err (!%p273_p10)
}
  0x1a   :  { %s277_s4 = scalar_lea.vmem %s28_s24, 1024  ;;  %p282_p12 = scmp.lt.s32.totalorder %s28_s24, %s28_s24 }
  0x1b   :  { %p278_p11 = scmp.ne.s32.totalorder %s28_s24, %s277_s4  ;;  %p283_p13 = scmp.lt.s32.totalorder %s277_s4, %s277_s4 }
  0x1d   :  { %p284_p0 = por %p283_p13, %p282_p12 }
  0x1f   :  { %p285_p1 = pnand %p284_p0, %p278_p11 }
  0x21   :  { %288 = shalt.err (!%p285_p1)
}
  0x22   :  { %33 = dma.hbm_to_vmem [thread:$0]  %s385_s1, 1024, %s28_s24, [#allocation6], %s318_s19, %s318_s19, %s319_s20  }
  0x23   :  { %311 = dma.done.wait [#allocation3], 128  }
  0x24   :  { %312 = vsyncadd [#allocation3], 4294967168 }
  0x25   :  { %313 = dma.done.wait [#allocation6], 1024  }
  0x26   :  { %314 = vsyncadd [#allocation6], 4294966272  ;;  %v321_v0 = vmov 0.0   ;;  %vm322_vm0 = vmmov 0   ;;  %v236_v1 = vld [vmem:[#allocation5] sm:$0xff]   ;;  %v237_v2 = vld [vmem:[#allocation5 + $0x8] sm:$0xff]  }
  0x27   :  { %209 = vmatprep.subr.bf16.mxu0 %v321_v0  ;;  %225 = vmatprep.mubr.msk.bf16.mxu0 %vm322_vm0, %v321_v0  ;;  %v238_v3 = vld [vmem:[#allocation5 + $0x10] sm:$0xff]   ;;  %v239_v4 = vld [vmem:[#allocation5 + $0x18] sm:$0xff]   ;;  %v240_v5 = vld [vmem:[#allocation5 + $0x20] sm:$0xff]   ;;  %s323_s1 = smov [#allocation7]  }
  0x28   :  { %210 = vmatpush3.bf16.msra.mxu0 %v236_v1  ;;  %v241_v6 = vld [vmem:[#allocation5 + $0x28] sm:$0xff]   ;;  %v242_v7 = vld [vmem:[#allocation5 + $0x30] sm:$0xff]   ;;  %v243_v8 = vld [vmem:[#allocation5 + $0x38] sm:$0xff]   ;;  %s169_s6 = sshll.u32 %s323_s1, 4  ;;  %s170_s6 = int_to_ptr.vmem [resolvable:$true] %s169_s6 }
  0x29   :  { %211 = vmatprep.subr.bf16.mxu0 %v321_v0  ;;  %v244_v9 = vld [vmem:[#allocation2] sm:$0xff]   ;;  %s289_s7 = scalar_lea.vmem %s170_s6, 128  ;;  %p294_p3 = scmp.lt.s32.totalorder %s170_s6, %s170_s6 }
  0x2a   :  { %p290_p2 = scmp.ne.s32.totalorder %s170_s6, %s289_s7  ;;  %p295_p4 = scmp.lt.s32.totalorder %s289_s7, %s289_s7 }
  0x2c   :  { %212 = vmatpush3.bf16.msra.mxu0 %v237_v2  ;;  %p296_p5 = por %p295_p4, %p294_p3 }
  0x2d   :  { %213 = vmatprep.subr.bf16.mxu0 %v321_v0 }
  0x2e   :  { %p297_p6 = pnand %p296_p5, %p290_p2 }
  0x30   :  { %214 = vmatpush3.bf16.msra.mxu0 %v238_v3 }
  0x31   :  { %215 = vmatprep.subr.bf16.mxu0 %v321_v0 }
  0x34   :  { %216 = vmatpush3.bf16.msra.mxu0 %v239_v4 }
  0x35   :  { %217 = vmatprep.subr.bf16.mxu0 %v321_v0 }
  0x38   :  { %218 = vmatpush3.bf16.msra.mxu0 %v240_v5 }
  0x39   :  { %219 = vmatprep.subr.bf16.mxu0 %v321_v0 }
  0x3c   :  { %220 = vmatpush3.bf16.msra.mxu0 %v241_v6 }
  0x3d   :  { %221 = vmatprep.subr.bf16.mxu0 %v321_v0 }
  0x40   :  { %222 = vmatpush3.bf16.msra.mxu0 %v242_v7 }
  0x41   :  { %223 = vmatprep.subr.bf16.mxu0 %v321_v0 }
  0x44   :  { %224 = vmatpush3.bf16.msra.mxu0 %v243_v8 }
  0x47   :  { %226 = vmatmul.mubr.bf16.vlgmr.msra.gmra.mrb[0].mxu0 %v244_v9 }
 0x11a   :  { %v147_v10 = vpop.f32.mrb[0].mxu0 }
 0x11b   :  { %v227_v11 = vpop.f32.mrb[1].mxu0 }
 0x11c   :  { %v150_v12 = vpop.f32.mrb[2].mxu0 }
 0x11d   :  { %v198_v13 = vpack.c.bf16 %v150_v12, %v147_v10  ;;  %v228_v14 = vpop.f32.mrb[3].mxu0 }
 0x11f   :  { %199 = vst [vmem:[#allocation7] sm:$0xff] %v198_v13  }
 0x120   :  { %300 = shalt.err (!%p297_p6)
}
 0x121   :  { %s301_s10 = scalar_lea.hbm %s386_s2, 128 }
 0x122   :  { %p302_p7 = scmp.ne.s32.totalorder %s386_s2, %s301_s10  ;;  %p305_p8 = scmp.lt.u32.totalorder %s301_s10, %s386_s2 }
 0x124   :  { %p307_p9 = pnand %p305_p8, %p302_p7 }
 0x126   :  { %310 = shalt.err (!%p307_p9)
}
 0x127   :  { %175 = dma.vmem_to_hbm [thread:$0]  %s170_s6, 128, %s386_s2, [#allocation4], %s318_s19, %s318_s19, %s319_s20  }
 0x128   :  { %315 = dma.done.wait [#allocation4], 128  }
 0x129   :  { %316 = vsyncadd [#allocation4], 4294967168 }
 0x12a   :  { %179 = vsyncpa [#allocation3], 1 }
 0x12b   :  { %180 = vsyncpa [#allocation6], 1 }
 0x12c   :  { %181 = vsyncpa [#allocation4], 1 }

</bundles_post_ra>
